<compile_context>
chip_gen: v6e
topology: v6e:2x2x1
jax: 0.10.0
libtpu: 0.0.40
codegen_flags: <defaults>
</compile_context>

<pallas_src>
import functools
import numpy as np
import jax
import jax.numpy as jnp
from jax import lax
from jax.experimental import pallas as pl
from jax.experimental.pallas import tpu as pltpu


# -----------------------------------------------------------------------------
# Deterministic parameter setup (plain NumPy glue, no pywt dependency).
# -----------------------------------------------------------------------------
def db2_filter_bank():
    s3 = np.sqrt(3.0)
    rec_lo = np.array([1.0 + s3, 3.0 + s3, 3.0 - s3, 1.0 - s3],
                      dtype=np.float64) / (4.0 * np.sqrt(2.0))
    dec_lo = rec_lo[::-1].copy()
    rec_hi = rec_lo[::-1].copy()
    rec_hi[1::2] *= -1.0                      # quadrature mirror filter
    dec_hi = rec_hi[::-1].copy()
    return dec_lo, dec_hi, rec_lo, rec_hi


def create_wavelet_filter_dec(in_size):
    """NumPy port of create_wavelet_filter() (decomposition filters only)."""
    dec_lo, dec_hi, _, _ = db2_filter_bank()
    dlo = dec_lo[::-1].copy()                 # == dec_lo[::-1] in the reference
    dhi = dec_hi[::-1].copy()
    filters = np.stack([np.outer(dlo, dlo),   # f0: LL
                        np.outer(dhi, dlo),   # f1: hi rows * lo cols
                        np.outer(dlo, dhi),   # f2: lo rows * hi cols
                        np.outer(dhi, dhi)],  # f3: HH
                       axis=0).astype(np.float32)
    dec_filters = np.tile(filters[:, None], (in_size, 1, 1, 1))   # (4*C, 1, k, k)
    return dec_filters, dlo.astype(np.float32), dhi.astype(np.float32)


def band_matrix(filt, out_len, in_len, pad, stride=2):
    """M[i, stride*i + a - pad] = filt[a], taps clipped at the edges.

    Clipping is exact because the reference conv uses zero padding; this lets
    us drop the padded copy of x entirely.
    """
    m = np.zeros((out_len, in_len), dtype=np.float32)
    for i in range(out_len):
        for a in range(len(filt)):
            idx = stride * i + a - pad
            if 0 <= idx < in_len:
                m[i, idx] = filt[a]
    return m


# -----------------------------------------------------------------------------
# Pallas kernel: a block of PB (H, W) planes -> PB (4*Ho, Wo) sub-band slabs.
# -----------------------------------------------------------------------------
def _dwt_kernel(x_ref, rs_ref, cs_ref, o_ref, *, ho, wo, precision):
    pb, h, w = x_ref.shape
    rs = rs_ref[...]                          # (2*Ho, H)  = [R_lo; R_hi]
    cs = cs_ref[...]                          # (W, 2*Wo)  = [C_lo^T | C_hi^T]

    # Column pass: one wide MXU matmul over all planes in the block.
    t = jnp.dot(x_ref[...].reshape(pb * h, w), cs,
                preferred_element_type=jnp.float32, precision=precision)
    t = t.reshape(pb, h, 2 * wo)

    # Row pass: one (2*Ho, H) @ (H, 2*Wo) matmul per plane (static unroll, no
    # cross-sublane transpose).  The quadrant split (cheap lane slices) puts
    # the sub-bands directly into the final [LL; HL; LH; HH] row order, so no
    # XLA-side transpose of the output is needed afterwards.
    for p in range(pb):
        y = jnp.dot(rs, t[p], preferred_element_type=jnp.float32,
                    precision=precision)      # (2*Ho, 2*Wo)
        o_ref[p, : 2 * ho, :] = y[:, :wo]     # rows: [f0=LL ; f1=HL]
        o_ref[p, 2 * ho:, :] = y[:, wo:]      # rows: [f2=LH ; f3=HH]


class NewDWT2D:
    """Pallas TPU port of New_DWT_2D(wave='db2', in_channels=C)."""

    _VMEM_BUDGET = 20 * 1024 * 1024   # working-set target for picking PB
    _VMEM_LIMIT = 32 * 1024 * 1024    # scoped-VMEM request (safe on v5e/v6e/v7x)
    _MAX_PB = 64                      # bound the in-kernel unroll

    def __init__(self, in_channels, precision=lax.Precision.HIGHEST):
        self.in_channels = in_channels
        dec_filters, dlo, dhi = create_wavelet_filter_dec(in_channels)
        self.kernel_size = len(dlo)                       # 4 for db2
        self.pad = self.kernel_size // 2 - 1              # 1 for db2
        self.dec_filters = jnp.asarray(dec_filters)       # (4*C, 1, k, k)
        self._dlo = dlo
        self._dhi = dhi
        self._band_cache = {}
        # NOTE(perf): DEFAULT / bf16 would cut MXU passes ~6x for very large
        # spatial sizes, but misses the 1e-4 check vs. the exact f32 conv
        # reference; HIGHEST stays the default (constructor knob).
        self.precision = precision

    def _band_ops(self, h, w, ho, wo):
        key = (h, w)
        if key not in self._band_cache:
            p = self.pad
            rs = np.concatenate([band_matrix(self._dlo, ho, h, p),
                                 band_matrix(self._dhi, ho, h, p)], axis=0)    # (2*Ho, H)
            cs = np.concatenate([band_matrix(self._dlo, wo, w, p).T,
                                 band_matrix(self._dhi, wo, w, p).T], axis=1)  # (W, 2*Wo)
            self._band_cache[key] = (jnp.asarray(rs), jnp.asarray(cs))
        return self._band_cache[key]

    @staticmethod
    def _choose_pb(planes, h, w, ho, wo, budget, max_pb):
        plane_in = h * w * 4
        plane_out = 4 * ho * wo * 4
        plane_tmp = h * (2 * wo) * 4                       # intermediate T
        filt = ((2 * ho) * h + w * (2 * wo)) * 4
        avail = budget - 2 * filt                          # filters double-buffered
        per_plane = 2 * (plane_in + plane_out) + plane_tmp
        pb = max(1, avail // per_plane) if avail > 0 else 1
        pb = int(min(pb, max_pb, planes))
        if planes >= 2:
            pb = max(1, min(pb, planes // 2))              # >=2 steps for v7x megacore
        while planes % pb:                                 # exact division, no partial blocks
            pb -= 1
        return pb

    def __call__(self, x):
        n, c, h, w = x.shape
        assert c == self.in_channels
        k, p = self.kernel_size, self.pad
        ho = (h + 2 * p - k) // 2 + 1
        wo = (w + 2 * p - k) // 2 + 1

        rs, cs = self._band_ops(h, w, ho, wo)

        planes = n * c
        xr = x.reshape(planes, h, w).astype(jnp.float32)   # free reshape, no pad copy

        pb = self._choose_pb(planes, h, w, ho, wo, self._VMEM_BUDGET, self._MAX_PB)
        grid = (planes // pb,)
        # TODO(synk): for extremely large H/W the stacked band matrices alone can
        # exceed the VMEM budget; add output-row tiling with a 2-row halo on x.

        out = pl.pallas_call(
            functools.partial(_dwt_kernel, ho=ho, wo=wo, precision=self.precision),
            out_shape=jax.ShapeDtypeStruct((planes, 4 * ho, wo), jnp.float32),
            grid=grid,
            in_specs=[
                pl.BlockSpec((pb, h, w), lambda i: (i, 0, 0)),
                pl.BlockSpec((2 * ho, h), lambda i: (0, 0)),
                pl.BlockSpec((w, 2 * wo), lambda i: (0, 0)),
            ],
            out_specs=pl.BlockSpec((pb, 4 * ho, wo), lambda i: (i, 0, 0)),
            compiler_params=pltpu.CompilerParams(
                dimension_semantics=("parallel",),
                vmem_limit_bytes=self._VMEM_LIMIT),
        )(xr, rs, cs)

        # (P, 4*Ho, Wo) with rows ordered [f0; f1; f2; f3] per plane is exactly the
        # PyTorch channel order 4*c + f  ->  pure (free) row-major reshape, no copy.
        return out.reshape(n, 4 * c, ho, wo)


def reference_forward(module, x):
    """XLA grouped-conv reference, identical semantics to the PyTorch module."""
    p = module.pad
    return lax.conv_general_dilated(
        x.astype(jnp.float32), module.dec_filters,
        window_strides=(2, 2), padding=((p, p), (p, p)),
        dimension_numbers=('NCHW', 'OIHW', 'NCHW'),
        feature_group_count=module.in_channels,
        precision=lax.Precision.HIGHEST)


if __name__ == "__main__":
    key = jax.random.PRNGKey(0)
    N, C, H, W = 2, 4, 16, 16
    x = jax.random.normal(key, (N, C, H, W), dtype=jnp.float32)

    module = NewDWT2D(in_channels=C)
    out = jax.block_until_ready(module(x))

    ref = jax.block_until_ready(reference_forward(module, x))
    assert out.shape == ref.shape == (N, 4 * C, H // 2, W // 2), (out.shape, ref.shape)
    np.testing.assert_allclose(np.asarray(out), np.asarray(ref),
                               rtol=1e-4, atol=1e-4)
    print("KERNEL_OK")
</pallas_src>

<mosaic_0001>
module attributes {stable_mosaic.version = 11 : i64} {
  func.func @_dwt_kernel(%arg0: i32, %arg1: memref<4x16x16xf32, #tpu.memory_space<vmem>>, %arg2: memref<16x16xf32, #tpu.memory_space<vmem>>, %arg3: memref<16x16xf32, #tpu.memory_space<vmem>>, %arg4: memref<4x32x8xf32, #tpu.memory_space<vmem>>) attributes {dimension_semantics = [#tpu.dimension_semantics<parallel>], iteration_bounds = array<i64: 2>, scalar_prefetch = 0 : i64, scratch_operands = 0 : i64, tpu.core_type = #tpu.core_type<tc>, window_params = [{transform_indices = @transform_0, window_bounds = array<i64: 4, 16, 16>}, {pipeline_mode = #tpu.pipeline_mode<synchronous>, transform_indices = @transform_1, window_bounds = array<i64: 16, 16>}, {pipeline_mode = #tpu.pipeline_mode<synchronous>, transform_indices = @transform_2, window_bounds = array<i64: 16, 16>}, {transform_indices = @transform_3, window_bounds = array<i64: 4, 32, 8>}]} {
    %c0 = arith.constant 0 : index
    %c0_0 = arith.constant 0 : index
    %0 = vector.load %arg2[%c0, %c0_0] : memref<16x16xf32, #tpu.memory_space<vmem>>, vector<16x16xf32>
    %c0_1 = arith.constant 0 : index
    %c0_2 = arith.constant 0 : index
    %1 = vector.load %arg3[%c0_1, %c0_2] : memref<16x16xf32, #tpu.memory_space<vmem>>, vector<16x16xf32>
    %c0_3 = arith.constant 0 : index
    %c0_4 = arith.constant 0 : index
    %c0_5 = arith.constant 0 : index
    %2 = vector.load %arg1[%c0_3, %c0_4, %c0_5] : memref<4x16x16xf32, #tpu.memory_space<vmem>>, vector<4x16x16xf32>
    %3 = vector.shape_cast %2 : vector<4x16x16xf32> to vector<64x16xf32>
    %cst = arith.constant dense<0.000000e+00> : vector<64x16xf32>
    %4 = tpu.matmul %3, %1, %cst {dimension_numbers = #tpu.dot_dimension_numbers<[1], [0], [0], [1], [0, 0, 1, 1], [], []>, precision = #tpu.contract_precision<fp32>} : vector<64x16xf32>, vector<16x16xf32>, vector<64x16xf32> -> vector<64x16xf32>
    %5 = vector.shape_cast %4 : vector<64x16xf32> to vector<4x16x16xf32>
    %6 = vector.extract_strided_slice %5 {offsets = [0, 0, 0], sizes = [1, 16, 16], strides = [1, 1, 1]} : vector<4x16x16xf32> to vector<1x16x16xf32>
    %7 = vector.shape_cast %6 : vector<1x16x16xf32> to vector<16x16xf32>
    %cst_6 = arith.constant dense<0.000000e+00> : vector<16x16xf32>
    %8 = tpu.matmul %0, %7, %cst_6 {dimension_numbers = #tpu.dot_dimension_numbers<[1], [0], [0], [1], [0, 0, 1, 1], [], []>, precision = #tpu.contract_precision<fp32>} : vector<16x16xf32>, vector<16x16xf32>, vector<16x16xf32> -> vector<16x16xf32>
    %9 = vector.extract_strided_slice %8 {offsets = [0, 0], sizes = [16, 8], strides = [1, 1]} : vector<16x16xf32> to vector<16x8xf32>
    %c0_7 = arith.constant 0 : index
    %c0_8 = arith.constant 0 : index
    %c0_9 = arith.constant 0 : index
    %10 = vector.load %arg4[%c0_7, %c0_8, %c0_9] : memref<4x32x8xf32, #tpu.memory_space<vmem>>, vector<1x16x8xf32>
    %11 = vector.shape_cast %10 : vector<1x16x8xf32> to vector<16x8xf32>
    %12 = vector.shape_cast %9 : vector<16x8xf32> to vector<1x16x8xf32>
    tpu.vector_store %arg4[%c0_7, %c0_8, %c0_9], %12 {strides = array<i32>} : memref<4x32x8xf32, #tpu.memory_space<vmem>>, vector<1x16x8xf32>,
    %13 = vector.extract_strided_slice %8 {offsets = [0, 8], sizes = [16, 8], strides = [1, 1]} : vector<16x16xf32> to vector<16x8xf32>
    %c0_10 = arith.constant 0 : index
    %c16 = arith.constant 16 : index
    %c0_11 = arith.constant 0 : index
    %14 = vector.load %arg4[%c0_10, %c16, %c0_11] : memref<4x32x8xf32, #tpu.memory_space<vmem>>, vector<1x16x8xf32>
    %15 = vector.shape_cast %14 : vector<1x16x8xf32> to vector<16x8xf32>
    %16 = vector.shape_cast %13 : vector<16x8xf32> to vector<1x16x8xf32>
    tpu.vector_store %arg4[%c0_10, %c16, %c0_11], %16 {strides = array<i32>} : memref<4x32x8xf32, #tpu.memory_space<vmem>>, vector<1x16x8xf32>,
    %17 = vector.extract_strided_slice %5 {offsets = [1, 0, 0], sizes = [1, 16, 16], strides = [1, 1, 1]} : vector<4x16x16xf32> to vector<1x16x16xf32>
    %18 = vector.shape_cast %17 : vector<1x16x16xf32> to vector<16x16xf32>
    %cst_12 = arith.constant dense<0.000000e+00> : vector<16x16xf32>
    %19 = tpu.matmul %0, %18, %cst_12 {dimension_numbers = #tpu.dot_dimension_numbers<[1], [0], [0], [1], [0, 0, 1, 1], [], []>, precision = #tpu.contract_precision<fp32>} : vector<16x16xf32>, vector<16x16xf32>, vector<16x16xf32> -> vector<16x16xf32>
    %20 = vector.extract_strided_slice %19 {offsets = [0, 0], sizes = [16, 8], strides = [1, 1]} : vector<16x16xf32> to vector<16x8xf32>
    %c1 = arith.constant 1 : index
    %c0_13 = arith.constant 0 : index
    %c0_14 = arith.constant 0 : index
    %21 = vector.load %arg4[%c1, %c0_13, %c0_14] : memref<4x32x8xf32, #tpu.memory_space<vmem>>, vector<1x16x8xf32>
    %22 = vector.shape_cast %21 : vector<1x16x8xf32> to vector<16x8xf32>
    %23 = vector.shape_cast %20 : vector<16x8xf32> to vector<1x16x8xf32>
    tpu.vector_store %arg4[%c1, %c0_13, %c0_14], %23 {strides = array<i32>} : memref<4x32x8xf32, #tpu.memory_space<vmem>>, vector<1x16x8xf32>,
    %24 = vector.extract_strided_slice %19 {offsets = [0, 8], sizes = [16, 8], strides = [1, 1]} : vector<16x16xf32> to vector<16x8xf32>
    %c1_15 = arith.constant 1 : index
    %c16_16 = arith.constant 16 : index
    %c0_17 = arith.constant 0 : index
    %25 = vector.load %arg4[%c1_15, %c16_16, %c0_17] : memref<4x32x8xf32, #tpu.memory_space<vmem>>, vector<1x16x8xf32>
    %26 = vector.shape_cast %25 : vector<1x16x8xf32> to vector<16x8xf32>
    %27 = vector.shape_cast %24 : vector<16x8xf32> to vector<1x16x8xf32>
    tpu.vector_store %arg4[%c1_15, %c16_16, %c0_17], %27 {strides = array<i32>} : memref<4x32x8xf32, #tpu.memory_space<vmem>>, vector<1x16x8xf32>,
    %28 = vector.extract_strided_slice %5 {offsets = [2, 0, 0], sizes = [1, 16, 16], strides = [1, 1, 1]} : vector<4x16x16xf32> to vector<1x16x16xf32>
    %29 = vector.shape_cast %28 : vector<1x16x16xf32> to vector<16x16xf32>
    %cst_18 = arith.constant dense<0.000000e+00> : vector<16x16xf32>
    %30 = tpu.matmul %0, %29, %cst_18 {dimension_numbers = #tpu.dot_dimension_numbers<[1], [0], [0], [1], [0, 0, 1, 1], [], []>, precision = #tpu.contract_precision<fp32>} : vector<16x16xf32>, vector<16x16xf32>, vector<16x16xf32> -> vector<16x16xf32>
    %31 = vector.extract_strided_slice %30 {offsets = [0, 0], sizes = [16, 8], strides = [1, 1]} : vector<16x16xf32> to vector<16x8xf32>
    %c2 = arith.constant 2 : index
    %c0_19 = arith.constant 0 : index
    %c0_20 = arith.constant 0 : index
    %32 = vector.load %arg4[%c2, %c0_19, %c0_20] : memref<4x32x8xf32, #tpu.memory_space<vmem>>, vector<1x16x8xf32>
    %33 = vector.shape_cast %32 : vector<1x16x8xf32> to vector<16x8xf32>
    %34 = vector.shape_cast %31 : vector<16x8xf32> to vector<1x16x8xf32>
    tpu.vector_store %arg4[%c2, %c0_19, %c0_20], %34 {strides = array<i32>} : memref<4x32x8xf32, #tpu.memory_space<vmem>>, vector<1x16x8xf32>,
    %35 = vector.extract_strided_slice %30 {offsets = [0, 8], sizes = [16, 8], strides = [1, 1]} : vector<16x16xf32> to vector<16x8xf32>
    %c2_21 = arith.constant 2 : index
    %c16_22 = arith.constant 16 : index
    %c0_23 = arith.constant 0 : index
    %36 = vector.load %arg4[%c2_21, %c16_22, %c0_23] : memref<4x32x8xf32, #tpu.memory_space<vmem>>, vector<1x16x8xf32>
    %37 = vector.shape_cast %36 : vector<1x16x8xf32> to vector<16x8xf32>
    %38 = vector.shape_cast %35 : vector<16x8xf32> to vector<1x16x8xf32>
    tpu.vector_store %arg4[%c2_21, %c16_22, %c0_23], %38 {strides = array<i32>} : memref<4x32x8xf32, #tpu.memory_space<vmem>>, vector<1x16x8xf32>,
    %39 = vector.extract_strided_slice %5 {offsets = [3, 0, 0], sizes = [1, 16, 16], strides = [1, 1, 1]} : vector<4x16x16xf32> to vector<1x16x16xf32>
    %40 = vector.shape_cast %39 : vector<1x16x16xf32> to vector<16x16xf32>
    %cst_24 = arith.constant dense<0.000000e+00> : vector<16x16xf32>
    %41 = tpu.matmul %0, %40, %cst_24 {dimension_numbers = #tpu.dot_dimension_numbers<[1], [0], [0], [1], [0, 0, 1, 1], [], []>, precision = #tpu.contract_precision<fp32>} : vector<16x16xf32>, vector<16x16xf32>, vector<16x16xf32> -> vector<16x16xf32>
    %42 = vector.extract_strided_slice %41 {offsets = [0, 0], sizes = [16, 8], strides = [1, 1]} : vector<16x16xf32> to vector<16x8xf32>
    %c3 = arith.constant 3 : index
    %c0_25 = arith.constant 0 : index
    %c0_26 = arith.constant 0 : index
    %43 = vector.load %arg4[%c3, %c0_25, %c0_26] : memref<4x32x8xf32, #tpu.memory_space<vmem>>, vector<1x16x8xf32>
    %44 = vector.shape_cast %43 : vector<1x16x8xf32> to vector<16x8xf32>
    %45 = vector.shape_cast %42 : vector<16x8xf32> to vector<1x16x8xf32>
    tpu.vector_store %arg4[%c3, %c0_25, %c0_26], %45 {strides = array<i32>} : memref<4x32x8xf32, #tpu.memory_space<vmem>>, vector<1x16x8xf32>,
    %46 = vector.extract_strided_slice %41 {offsets = [0, 8], sizes = [16, 8], strides = [1, 1]} : vector<16x16xf32> to vector<16x8xf32>
    %c3_27 = arith.constant 3 : index
    %c16_28 = arith.constant 16 : index
    %c0_29 = arith.constant 0 : index
    %47 = vector.load %arg4[%c3_27, %c16_28, %c0_29] : memref<4x32x8xf32, #tpu.memory_space<vmem>>, vector<1x16x8xf32>
    %48 = vector.shape_cast %47 : vector<1x16x8xf32> to vector<16x8xf32>
    %49 = vector.shape_cast %46 : vector<16x8xf32> to vector<1x16x8xf32>
    tpu.vector_store %arg4[%c3_27, %c16_28, %c0_29], %49 {strides = array<i32>} : memref<4x32x8xf32, #tpu.memory_space<vmem>>, vector<1x16x8xf32>,
    return
  }
  func.func @transform_0(%arg0: i32) -> (i32, i32, i32) {
    %c0_i32 = arith.constant 0 : i32
    %c0_i32_0 = arith.constant 0 : i32
    %c0_i32_1 = arith.constant 0 : i32
    return %arg0, %c0_i32, %c0_i32_0 : i32, i32, i32
  }
  func.func @transform_1(%arg0: i32) -> (i32, i32) {
    %c0_i32 = arith.constant 0 : i32
    %c0_i32_0 = arith.constant 0 : i32
    %c0_i32_1 = arith.constant 0 : i32
    return %c0_i32, %c0_i32_0 : i32, i32
  }
  func.func @transform_2(%arg0: i32) -> (i32, i32) {
    %c0_i32 = arith.constant 0 : i32
    %c0_i32_0 = arith.constant 0 : i32
    %c0_i32_1 = arith.constant 0 : i32
    return %c0_i32, %c0_i32_0 : i32, i32
  }
  func.func @transform_3(%arg0: i32) -> (i32, i32, i32) {
    %c0_i32 = arith.constant 0 : i32
    %c0_i32_0 = arith.constant 0 : i32
    %c0_i32_1 = arith.constant 0 : i32
    return %arg0, %c0_i32, %c0_i32_0 : i32, i32, i32
  }
}

</mosaic_0001>

<bundles_post_ra>
// kernel: tpu_custom_call.1
= control target key start
LH: loop header
LB: loop body
LE: loop exit
PB: predicated region body
PF: predicated region fallthrough
CT: control target
= control target key end

     0   :  { %8 = vsyncpa [#allocation3], 0  ;;  %s4365_s0 = inlined_call_operand.hbm [shape: f32[8,16,16], index: 0, kind: input, shape index: {}]   ;;  %s4366_s1 = inlined_call_operand.hbm [shape: f32[16,16], index: 1, kind: input, shape index: {}]   ;;  %s4367_s2 = inlined_call_operand.hbm [shape: f32[16,16], index: 2, kind: input, shape index: {}]   ;;  %s4368_s3 = inlined_call_operand.vmem [shape: f32[8,32,8], index: 3, kind: output, shape index: {}]  }
   0x1   :  { %10 = vsyncpa [#allocation3 + $0x1], 0 }
   0x2   :  { %11 = vsyncpa [#allocation5], 0  ;;  %s3839_s12 = smov 0   ;;  %s3841_s13 = smov 0  }
   0x3   :  { %s3843_s14 = smov 0   ;;  %s3845_s15 = smov 0  }
   0x4 LB: > { %s3176_s16 = sadd.s32 4294967295, %s3811_s15   ;;  %p37_p0 = scmp.ne.s32.totalorder %s3803_s13, %s3799_s12  ;;  %s3811_s15 = sphi %s3845_s15, %s4384_s15   ;;  %s3807_s14 = sphi %s3843_s14, %s4383_s14   ;;  %s3803_s13 = sphi %s3841_s13, %s4382_s13   ;;  %s3799_s12 = sphi %s3839_s12, %s4381_s12  }
   0x5   : > { %p3861_p1 = scmp.eq.s32.totalorder %s3176_s16, 0  ;;  %p3178_p2 = scmp.ge.s32.totalorder %s3811_s15, 1 }
   0x6   : > { %p116_p3 = scmp.lt.s32.totalorder %s3811_s15, 3  ;;  %s3813_s20 = smov [#allocation4]  }
   0x7   : > { %s4373_s17 = scalar_select %p3861_p1, 1, 0 }
   0x8   : > { %p3869_p4 = por %p3861_p1, %p37_p0  ;;  %p3873_p5 = pnand %p3178_p2, %p116_p3 }
   0x9   : > { %s128_s21 = sshll.u32 %s3813_s20, 4  ;;  %s3814_s23 = smov [#allocation6]   ;;  %s129_s21 = int_to_ptr.vmem [resolvable:$true] %s128_s21 }
   0xa   : > { %s4374_s18 = scalar_select %p3869_p4, 1, 0 }
   0xb   : > { %s4375_s19 = scalar_select %p3873_p5, 1, 0 }
   0xc   : > { %p3640_p6 = pneg %p3873_p5  ;;  %s141_s24 = sshll.u32 %s3814_s23, 4  ;;  %s142_s24 = int_to_ptr.vmem [resolvable:$true] %s141_s24 }
   0xd   : > { %s3704_s25 = scalar_lea.vmem %s129_s21, 256  ;;  %p3712_p12 = scmp.lt.s32.totalorder %s129_s21, %s129_s21 }
   0xe   : > { %p3881_p7 = pnand %p3640_p6, %p3861_p1  ;;  %p3705_p9 = scmp.ne.s32.totalorder %s129_s21, %s3704_s25 }
   0xf   : > { %p3713_p13 = scmp.lt.s32.totalorder %s3704_s25, %s3704_s25 }
  0x10   : > { %p3695_p8 = pneg %p3881_p7 }
  0x11   : > { %p3714_p0 = por %p3713_p13, %p3712_p12 }
  0x12   : > { %p3707_p10 = pnand %p3705_p9, %p3695_p8 }
  0x14   : > { %p3708_p11 = pneg %p3707_p10 }
  0x16   : > { %p3715_p2 = pnand %p3714_p0, %p3708_p11 }
  0x18   : > { %3718 = shalt.err (!%p3715_p2)
}
  0x19   : > { %s3815_s26 = smov 128   ;;  %s3816_s27 = smov 8  }
  0x1a   : > { %3643 = dma.hbm_to_vmem [thread:$0]  (!%p3881_p7), %s4366_s1, 256, %s129_s21, [#allocation5], %s3815_s26, %s3815_s26, %s3816_s27  }
  0x1b   : > { %s3730_s30 = scalar_lea.vmem %s142_s24, 256  ;;  %p3738_p10 = scmp.lt.s32.totalorder %s142_s24, %s142_s24 }
  0x1c   : > { %p3731_p3 = scmp.ne.s32.totalorder %s142_s24, %s3730_s30  ;;  %p3739_p11 = scmp.lt.s32.totalorder %s3730_s30, %s3730_s30 }
  0x1e   : > { %p3733_p6 = pnand %p3731_p3, %p3695_p8  ;;  %p3740_p12 = por %p3739_p11, %p3738_p10 }
  0x20   : > { %p3734_p9 = pneg %p3733_p6 }
  0x22   : > { %p3741_p13 = pnand %p3740_p12, %p3734_p9 }
  0x24   : > { %3744 = shalt.err (!%p3741_p13)
}
  0x25   : > { %3646 = dma.hbm_to_vmem [thread:$0]  (!%p3881_p7), %s4367_s2, 256, %s142_s24, [#allocation5], %s3815_s26, %s3815_s26, %s3816_s27  }
  0x26   : > { %s3910_s6 = sadd.s32 1, %s3811_s15   ;;  %s24_s7 = sadd.s32 1, %s3807_s14 }
  0x27   : > { %s21_s8 = ssub.s32 %s3811_s15, %s3910_s6  ;;  %p31_p8 = scmp.ne.s32.totalorder %s3807_s14, %s3803_s13 }
  0x28   : > { %p22_p0 = scmp.eq.s32.totalorder %s21_s8, 0  ;;  %p32_p2 = scmp.eq.s32.totalorder %s3811_s15, 0 }
  0x29   : > { %p3653_p3 = scmp.lt.s32.totalorder %s3811_s15, 2  ;;  %s155_s9 = sand.u32 1, %s3807_s14  }
  0x2a   : > { %s3921_s10 = scalar_select %p22_p0, %s3807_s14, %s24_s7  }
  0x2b   : > { %p33_p6 = por %p32_p2, %p31_p8  ;;  %s3182_s11 = sshll.u32 %s155_s9, 6 }
  0x2c   : > { %s3208_s12 = sshll.u32 %s3811_s15, 10  ;;  %s159_s23 = scalar_lea.vmem [#allocation2], %s3182_s11 }
  0x2d   : > { %s3927_s22 = scalar_lea.hbm %s4365_s0, %s3208_s12  ;;  %s167_s24 = sshll.u32 %s159_s23, 4  ;;  %s3933_s24 = int_to_ptr.vmem [resolvable:$true] %s167_s24 }
  0x2e   : > { %p3929_p7 = pnand %p3653_p3, %p33_p6  ;;  %s3935_s28 = scalar_lea.sflag [#allocation3], %s155_s9 }
  0x2f   : > { %s3745_s29 = scalar_lea.hbm %s3927_s22, 1024  ;;  %s3750_s5 = scalar_lea.hbm %s4365_s0, 2048 }
  0x30   : > { %p3746_p9 = scmp.ne.s32.totalorder %s3927_s22, %s3745_s29  ;;  %p3747_p10 = pneg %p3929_p7 }
  0x31   : > { %p3751_p13 = scmp.lt.s32.totalorder %s3927_s22, %s4365_s0  ;;  %p3752_p8 = scmp.lt.s32.totalorder %s3750_s5, %s3745_s29 }
  0x32   : > { %p3748_p11 = pnand %p3747_p10, %p3746_p9 }
  0x33   : > { %p3753_p0 = por %p3752_p8, %p3751_p13 }
  0x34   : > { %p3749_p12 = pneg %p3748_p11 }
  0x36   : > { %p3754_p2 = pnand %p3753_p0, %p3749_p12 }
  0x38   : > { %3757 = shalt.err (!%p3754_p2)
}
  0x39   : > { %s3758_s9 = scalar_lea.vmem %s3933_s24, 1024  ;;  %s3817_s11 = smov [#allocation2]  }
  0x3a   : > { %p3759_p3 = scmp.ne.s32.totalorder %s3933_s24, %s3758_s9  ;;  %s3763_s12 = sshll.u32 %s3817_s11, 4  ;;  %s3764_s12 = int_to_ptr.vmem [resolvable:$false] %s3763_s12 }
  0x3b   : > { %s3765_s20 = scalar_lea.vmem %s3764_s12, 2048  ;;  %p3766_p11 = scmp.lt.s32.totalorder %s3933_s24, %s3764_s12 }
  0x3c   : > { %p3761_p6 = pnand %p3759_p3, %p3747_p10  ;;  %p3767_p1 = scmp.lt.s32.totalorder %s3765_s20, %s3758_s9 }
  0x3e   : > { %p3762_p9 = pneg %p3761_p6  ;;  %p3768_p4 = por %p3767_p1, %p3766_p11 }
  0x40   : > { %p3769_p5 = pnand %p3768_p4, %p3762_p9 }
  0x42   : > { %3772 = shalt.err (!%p3769_p5)
}
  0x43   : > { %3650 = dma.hbm_to_vmem [thread:$0]  (!%p3929_p7), %s3927_s22, 1024, %s3933_s24, %s3935_s28, %s3815_s26, %s3815_s26, %s3816_s27  }
  0x44   : > { %p4378_p10 = scmp.ne.s32.totalorder %s4375_s19, 0 }
  0x45   : > { %s181_s21 = sand.u32 (!%p4378_p10), 1, %s3803_s13   ;;  %p4379_p1 = scmp.ne.s32.totalorder (!%p4378_p10), %s4374_s18, 0 }
  0x46   : > { %179 = sbr.rel (%p4378_p10) target bundleno = 712 (0x2c8), region = 32  ;;  %s3187_s23 = sshll.u32 (!%p4378_p10), %s181_s21, 6 }
  0x47   : > { %s182_s29 = scalar_lea.sflag (!%p4378_p10), [#allocation3], %s181_s21  ;;  %s3962_s30 = scalar_lea.vmem (!%p4378_p10), [#allocation2], %s3187_s23 }
  0x4b   : > { %3790 = dma.done.wait (%p4379_p1), %s182_s29, 1024  }
  0x4c   : > { %3792 = vsyncadd (%p4379_p1), %s182_s29, 4294966272  ;;  %p4380_p4 = scmp.ne.s32.totalorder %s4373_s17, 0 }
  0x4e   : > { %3794 = dma.done.wait (%p4380_p4), [#allocation5], 512  }
  0x4f   : > { %3796 = vsyncadd (%p4380_p4), [#allocation5], 4294966784  ;;  %vm237_vm0 = vcmask 130048   ;;  %v228_v0 = vld [vmem:[#allocation6 + $0x8] sm:$0xff]  ;;  %v227_v1 = vld [vmem:[#allocation6] sm:$0xff]  ;;  %s3190_s17 = sshll.u32 %s3176_s16, 2 }
  0x50   : > { %v229_v2 = vld [vmem:[%s3962_s30] sm:$0xff]  ;;  %v3973_v3 = vand.u32 4294901760, %v228_v0  ;;  %v3975_v4 = vand.u32 4294901760, %v227_v1  ;;  %v230_v6 = vld [vmem:[%s3962_s30 + $0x8] sm:$0xff]  ;;  %v231_v7 = vld [vmem:[%s3962_s30 + $0x10] sm:$0xff]  ;;  %p219_p5 = scmp.lt.s32.totalorder %s3190_s17, 7 }
  0x51   : > { %v239_v5 = vsel %vm237_vm0, %v229_v2, 0  ;;  %v232_v8 = vld [vmem:[%s3962_s30 + $0x18] sm:$0xff]  ;;  %v242_v10 = vsel %vm237_vm0, %v230_v6, 0  ;;  %v245_v11 = vsel %vm237_vm0, %v231_v7, 0  ;;  %v233_v13 = vld [vmem:[%s3962_s30 + $0x20] sm:$0xff]  ;;  %v234_v14 = vld [vmem:[%s3962_s30 + $0x28] sm:$0xff] }
  0x52   : > { %v3981_v9 = vand.u32 4294901760, %v239_v5  ;;  %v248_v12 = vsel %vm237_vm0, %v232_v8, 0  ;;  %3366 = vmatprep.subr.mxu0 %v3973_v3  ;;  %v439_v15 = vsub.f32 %v228_v0, %v3973_v3  ;;  %v3990_v16 = vand.u32 4294901760, %v242_v10  ;;  %v235_v39 = vld [vmem:[%s3962_s30 + $0x30] sm:$0xff]  ;;  %v236_v40 = vld [vmem:[%s3962_s30 + $0x38] sm:$0xff]  ;;  %s4386_s17 = smov (!%p219_p5, %s3190_s17), 7 }
  0x53   : > { %v3993_v17 = vsub.f32 %v227_v1, %v3975_v4  ;;  %v3995_v18 = vand.u32 4294901760, %v245_v11  ;;  %3367 = vmatpush3.msra.mxu0 %v3973_v3  ;;  %v4002_v20 = vand.u32 4294901760, %v248_v12  ;;  %v251_v21 = vsel %vm237_vm0, %v233_v13, 0  ;;  %s3209_s18 = sshll.u32 %s4386_s17, 5  ;;  %s3818_s26 = smov 120  }
  0x54   : > { %v3999_v19 = vsub.f32 %v239_v5, %v3981_v9  ;;  %3386 = vmatprep.mubr.f32.mxu1 %v3981_v9  ;;  %v254_v22 = vsel %vm237_vm0, %v234_v14, 0  ;;  %3368 = vmatprep.subr.mxu0 %v3975_v4  ;;  %v4007_v23 = vand.u32 4294901760, %v439_v15  ;;  %v4010_v24 = vsub.f32 %v242_v10, %v3990_v16  ;;  %s4310_s19 = scalar_lea.vmem %s4368_s3, %s3209_s18 }
  0x55   : > { %v4013_v25 = vand.u32 4294901760, %v3993_v17  ;;  %v4016_v26 = vsub.f32 %v245_v11, %v3995_v18  ;;  %3369 = vmatpush3.msra.mxu0 %v3975_v4  ;;  %v4021_v28 = vsub.f32 %v248_v12, %v4002_v20  ;;  %v4023_v29 = vand.u32 4294901760, %v251_v21 }
  0x56   : > { %v331_v27 = vand.u32 4294901760, %v3999_v19  ;;  %v4025_v30 = vand.u32 4294901760, %v254_v22  ;;  %v441_v31 = vsub.f32 %v439_v15, %v4007_v23  ;;  %v341_v32 = vand.u32 4294901760, %v4010_v24  ;;  %3398 = vmatprep.subr.mxu0 %v439_v15 }
  0x57   : > { %v448_v33 = vsub.f32 %v3993_v17, %v4013_v25  ;;  %v351_v34 = vand.u32 4294901760, %v4016_v26  ;;  %v361_v36 = vand.u32 4294901760, %v4021_v28  ;;  %v4037_v37 = vsub.f32 %v251_v21, %v4023_v29 }
  0x58   : > { %v332_v35 = vsub.f32 %v3999_v19, %v331_v27  ;;  %v4040_v38 = vsub.f32 %v254_v22, %v4025_v30  ;;  %v442_v41 = vand.u32 4294901760, %v441_v31  ;;  %v342_v42 = vsub.f32 %v4010_v24, %v341_v32 }
  0x59   : > { %v449_v43 = vand.u32 4294901760, %v448_v33  ;;  %v352_v44 = vsub.f32 %v4016_v26, %v351_v34  ;;  %v362_v46 = vsub.f32 %v4021_v28, %v361_v36  ;;  %v371_v47 = vand.u32 4294901760, %v4037_v37 }
  0x5a   : > { %v333_v45 = vand.u32 4294901760, %v332_v35  ;;  %v381_v48 = vand.u32 4294901760, %v4040_v38  ;;  %3382 = vmatprep.subr.mxu1 %v442_v41  ;;  %v343_v49 = vand.u32 4294901760, %v342_v42  ;;  %v257_v51 = vsel %vm237_vm0, %v235_v39, 0 }
  0x5b   : > { %v353_v50 = vand.u32 4294901760, %v352_v44  ;;  %v260_v52 = vsel %vm237_vm0, %v236_v40, 0  ;;  %3383 = vmatpush3.msra.mxu1 %v442_v41  ;;  %v372_v53 = vsub.f32 %v4037_v37, %v371_v47  ;;  %v4058_v54 = vand.u32 4294901760, %v257_v51 }
  0x5c   : > { %3370 = vmatprep.mubr.f32.mxu0 %v333_v45  ;;  %3384 = vmatprep.subr.mxu1 %v449_v43  ;;  %v363_v55 = vand.u32 4294901760, %v362_v46  ;;  %v382_v56 = vsub.f32 %v4040_v38, %v381_v48  ;;  %v4063_v57 = vand.u32 4294901760, %v260_v52  ;;  %vm1530_vm1 = vcmask 64512  }
  0x5d   : > { %3371 = vmatmul.mubr.f32.vlgmr.msra.gmra.mxu0 %v343_v49  ;;  %3385 = vmatpush3.msra.mxu1 %v449_v43  ;;  %v373_v58 = vand.u32 4294901760, %v372_v53  ;;  %v390_v59 = vsub.f32 %v257_v51, %v4058_v54 }
  0x5e   : > { %3373 = vmatprep.mubr.f32.mxu0 %v353_v50  ;;  %3387 = vmatmul.mubr.f32.vlgmr.msra.gmra.mxu1 %v3990_v16  ;;  %v400_v60 = vsub.f32 %v260_v52, %v4063_v57  ;;  %v383_v62 = vand.u32 4294901760, %v382_v56 }
  0x5f   : > { %3399 = vmatpush3.msra.mxu0 %v439_v15  ;;  %3389 = vmatprep.mubr.f32.mxu1 %v3995_v18  ;;  %v391_v61 = vand.u32 4294901760, %v390_v59 }
  0x60   : > { %3400 = vmatprep.subr.mxu0 %v3993_v17  ;;  %v401_v63 = vand.u32 4294901760, %v400_v60  ;;  %3414 = vmatprep.subr.mxu1 %v3973_v3 }
  0x61   : > { %3374 = vmatmul.mubr.f32.gmra.mxu0 %v363_v55  ;;  %v392_v0 = vsub.f32 %v390_v59, %v391_v61  ;;  %3415 = vmatpush3.msra.mxu1 %v3973_v3 }
  0x62   : > { %3376 = vmatprep.mubr.f32.mxu0 %v373_v58  ;;  %3401 = vmatpush3.msra.mxu0 %v3993_v17  ;;  %v402_v1 = vsub.f32 %v400_v60, %v401_v63 }
  0x63   : > { %3390 = vmatmul.mubr.f32.gmra.mxu1 %v4002_v20  ;;  %3430 = vmatprep.subr.mxu0 %v4007_v23  ;;  %v393_v2 = vand.u32 4294901760, %v392_v0 }
  0x64   : > { %3392 = vmatprep.mubr.f32.mxu1 %v4023_v29  ;;  %v403_v5 = vand.u32 4294901760, %v402_v1  ;;  %3416 = vmatprep.subr.mxu1 %v3975_v4 }
  0x65   : > { %3377 = vmatmul.mubr.f32.gmra.mxu0 %v383_v62  ;;  %3417 = vmatpush3.msra.mxu1 %v3975_v4 }
  0x66   : > { %3379 = vmatprep.mubr.f32.mxu0 %v393_v2  ;;  %3446 = vmatprep.subr.mxu1 %v3973_v3 }
  0x67   : > { %3393 = vmatmul.mubr.f32.gmra.mxu1 %v4025_v30 }
  0x68   : > { %3395 = vmatprep.mubr.f32.mxu1 %v4058_v54 }
  0x69   : > { %3380 = vmatmul.mubr.f32.gmra.mxu0 %v403_v5 }
  0x6a   : > { %3402 = vmatprep.mubr.f32.mxu0 %v3999_v19 }
  0x6b   : > { %3396 = vmatmul.mubr.f32.gmra.mxu1 %v4063_v57 }
  0x6c   : > { %3418 = vmatprep.mubr.f32.mxu1 %v331_v27 }
  0x6d   : > { %3403 = vmatmul.mubr.f32.vlgmr.msra.gmra.mxu0 %v4010_v24 }
  0x6e   : > { %3405 = vmatprep.mubr.f32.mxu0 %v4016_v26  ;;  %3431 = vmatpush3.msra.mxu0 %v4007_v23 }
  0x6f   : > { %3419 = vmatmul.mubr.f32.vlgmr.msra.gmra.mxu1 %v341_v32  ;;  %3432 = vmatprep.subr.mxu0 %v4013_v25 }
  0x70   : > { %3421 = vmatprep.mubr.f32.mxu1 %v351_v34  ;;  %3433 = vmatpush3.msra.mxu0 %v4013_v25 }
  0x71   : > { %3406 = vmatmul.mubr.f32.gmra.mxu0 %v4021_v28  ;;  %3447 = vmatpush3.msra.mxu1 %v3973_v3  ;;  %v225_v3 = vld [vmem:[#allocation4] sm:$0xff]  ;;  %v226_v28 = vld [vmem:[#allocation4 + $0x8] sm:$0xff] }
  0x72   : > { %3408 = vmatprep.mubr.f32.mxu0 %v4037_v37  ;;  %3448 = vmatprep.subr.mxu1 %v3975_v4  ;;  %v1026_v31 = vsel %vm237_vm0, %v226_v28, 0 }
  0x73   : > { %3422 = vmatmul.mubr.f32.gmra.mxu1 %v361_v36  ;;  %v4152_v36 = vand.u32 4294901760, %v1026_v31 }
  0x74   : > { %3424 = vmatprep.mubr.f32.mxu1 %v371_v47  ;;  %3449 = vmatpush3.msra.mxu1 %v3975_v4  ;;  %v1023_v4 = vsel %vm237_vm0, %v225_v3, 0 }
  0x75   : > { %3409 = vmatmul.mubr.f32.gmra.mxu0 %v4040_v38  ;;  %v4121_v6 = vand.u32 4294901760, %v1023_v4  ;;  %v4161_v42 = vsub.f32 %v1026_v31, %v4152_v36 }
  0x76   : > { %3411 = vmatprep.mubr.f32.mxu0 %v390_v59 }
  0x77   : > { %3425 = vmatmul.mubr.f32.gmra.mxu1 %v381_v48  ;;  %v4124_v7 = vsub.f32 %v1023_v4, %v4121_v6  ;;  %v4172_v51 = vand.u32 4294901760, %v4161_v42 }
  0x78   : > { %3427 = vmatprep.mubr.f32.mxu1 %v391_v61 }
  0x79   : > { %3412 = vmatmul.mubr.f32.gmra.mxu0 %v400_v60  ;;  %v4128_v8 = vand.u32 4294901760, %v4124_v7  ;;  %v1108_v61 = vsub.f32 %v4161_v42, %v4172_v51 }
  0x7a   : > { %3434 = vmatprep.mubr.f32.mxu0 %v3981_v9 }
  0x7b   : > { %3428 = vmatmul.mubr.f32.gmra.mxu1 %v401_v63 }
  0x7c   : > { %3450 = vmatprep.mubr.f32.mxu1 %v3981_v9  ;;  %v1098_v9 = vsub.f32 %v4124_v7, %v4128_v8 }
  0x7d   : > { %3435 = vmatmul.mubr.f32.vlgmr.msra.gmra.mxu0 %v3990_v16 }
  0x7e   : > { %3437 = vmatprep.mubr.f32.mxu0 %v3995_v18  ;;  %v4132_v10 = vand.u32 4294901760, %v1098_v9 }
  0x7f   : > { %3451 = vmatmul.mubr.f32.vlgmr.msra.gmra.mxu1 %v3990_v16 }
  0x80   : > { %3453 = vmatprep.mubr.f32.mxu1 %v3995_v18 }
  0x81   : > { %3438 = vmatmul.mubr.f32.gmra.mxu0 %v4002_v20 }
  0x82   : > { %3440 = vmatprep.mubr.f32.mxu0 %v4023_v29 }
  0x83   : > { %3454 = vmatmul.mubr.f32.gmra.mxu1 %v4002_v20 }
  0x84   : > { %3456 = vmatprep.mubr.f32.mxu1 %v4023_v29 }
  0x85   : > { %3441 = vmatmul.mubr.f32.gmra.mxu0 %v4025_v30 }
  0x86   : > { %3443 = vmatprep.mubr.f32.mxu0 %v4058_v54 }
  0x87   : > { %3457 = vmatmul.mubr.f32.gmra.mxu1 %v4025_v30 }
  0x88   : > { %3459 = vmatprep.mubr.f32.mxu1 %v4058_v54 }
  0x89   : > { %3444 = vmatmul.mubr.f32.gmra.mxu0 %v4063_v57 }
  0x8a   : > { %3466 = vmatprep.mubr.f32.mxu0 %v4132_v10 }
  0x8b   : > { %3460 = vmatmul.mubr.f32.gmra.mxu1 %v4063_v57 }
  0x8c   : > { %3473 = vmatprep.mubr.f32.mxu1 %v4121_v6 }
 0x11d   : > { %v3372_v11 = vpop.f32.mrf.mxu0 }
 0x11e   : > { %v3388_v13 = vpop.f32.mrf.mxu1 }
 0x11f   : > { %v335_v12 = vpop.f32.mrf.mxu0  ;;  %v493_v39 = vadd.f32 %v3388_v13, %v3372_v11 }
 0x120   : > { %v486_v15 = vpop.f32.mrf.mxu1 }
 0x121   : > { %v3375_v14 = vpop.f32.mrf.mxu0  ;;  %v487_v43 = vadd.f32 %v486_v15, %v335_v12 }
 0x123   : > { %v355_v16 = vpop.f32.mrf.mxu0  ;;  %v3391_v17 = vpop.f32.mrf.mxu1 }
 0x124   : > { %v505_v47 = vadd.f32 %v3391_v17, %v3375_v14 }
 0x125   : > { %v4135_v18 = vpop.f32.mrf.mxu0  ;;  %v498_v19 = vpop.f32.mrf.mxu1 }
 0x126   : > { %v499_v56 = vadd.f32 %v498_v19, %v355_v16  ;;  %v4184_v16 = vand.u32 4294901760, %v1108_v61 }
 0x127   : > { %v4137_v20 = vpop.f32.mrf.mxu0  ;;  %v4139_v21 = vpop.f32.mrf.mxu1 }
 0x129   : > { %v4141_v22 = vpop.f32.mrf.mxu0  ;;  %v4143_v23 = vpop.f32.mrf.mxu1 }
 0x12b   : > { %v4145_v24 = vpop.f32.mrf.mxu0  ;;  %v4147_v25 = vpop.f32.mrf.mxu1 }
 0x12d   : > { %v4149_v26 = vpop.f32.mrf.mxu1  ;;  %v3404_v27 = vpop.f32.mrf.mxu0 }
 0x12e   : > { %v612_v44 = vadd.f32 %v3404_v27, %v493_v39 }
 0x12f   : > { %v604_v29 = vpop.f32.mrf.mxu0  ;;  %v3420_v30 = vpop.f32.mrf.mxu1 }
 0x130   : > { %v605_v48 = vadd.f32 %v604_v29, %v487_v43  ;;  %v737_v52 = vadd.f32 %v3420_v30, %v612_v44 }
 0x131   : > { %v3407_v32 = vpop.f32.mrf.mxu0  ;;  %v728_v33 = vpop.f32.mrf.mxu1 }
 0x132   : > { %v626_v53 = vadd.f32 %v3407_v32, %v505_v47  ;;  %v729_v57 = vadd.f32 %v728_v33, %v605_v48  ;;  %v511_v48 = vadd.f32 %v4143_v23, %v4137_v20 }
 0x133   : > { %v618_v34 = vpop.f32.mrf.mxu0  ;;  %v3423_v35 = vpop.f32.mrf.mxu1 }
 0x134   : > { %v619_v62 = vadd.f32 %v618_v34, %v499_v56  ;;  %v753_v63 = vadd.f32 %v3423_v35, %v626_v53 }
 0x135   : > { %v4154_v37 = vpop.f32.mrf.mxu0  ;;  %v744_v38 = vpop.f32.mrf.mxu1 }
 0x136   : > { %v745_v13 = vadd.f32 %v744_v38, %v619_v62  ;;  %v517_v38 = vadd.f32 %v4139_v21, %v4135_v18 }
 0x137   : > { %v4156_v40 = vpop.f32.mrf.mxu0  ;;  %v4158_v41 = vpop.f32.mrf.mxu1 }
 0x138   : > { %v640_v43 = vadd.f32 %v4154_v37, %v517_v38  ;;  %v633_v21 = vadd.f32 %v4156_v40, %v511_v48 }
 0x139   : > { %v4163_v45 = vpop.f32.mrf.mxu0  ;;  %v4165_v46 = vpop.f32.mrf.mxu1 }
 0x13a   : > { %v769_v37 = vadd.f32 %v4158_v41, %v640_v43  ;;  %v761_v41 = vadd.f32 %v4165_v46, %v633_v21 }
 0x13b   : > { %v4167_v49 = vpop.f32.mrf.mxu0  ;;  %v4169_v50 = vpop.f32.mrf.mxu1 }
 0x13d   : > { %v4174_v54 = vpop.f32.mrf.mxu1  ;;  %v3436_v55 = vpop.f32.mrf.mxu0 }
 0x13e   : > { %v868_v58 = vadd.f32 %v3436_v55, %v737_v52 }
 0x13f   : > { %v861_v59 = vpop.f32.mrf.mxu0  ;;  %v3452_v60 = vpop.f32.mrf.mxu1 }
 0x140   : > { %v862_v0 = vadd.f32 %v861_v59, %v729_v57  ;;  %v983_v1 = vadd.f32 %v3452_v60, %v868_v58 }
 0x141   : > { %v3439_v2 = vpop.f32.mrf.mxu0  ;;  %v976_v5 = vpop.f32.mrf.mxu1 }
 0x142   : > { %v4178_v3 = vand.u32 4294901760, %v983_v1  ;;  %v880_v4 = vadd.f32 %v3439_v2, %v753_v63  ;;  %v977_v9 = vadd.f32 %v976_v5, %v862_v0  ;;  %v529_v63 = vadd.f32 %v4147_v25, %v4141_v22 }
 0x143   : > { %v873_v11 = vpop.f32.mrf.mxu0  ;;  %v3455_v12 = vpop.f32.mrf.mxu1  ;;  %v523_v22 = vadd.f32 %v4149_v26, %v4145_v24 }
 0x144   : > { %v1145_v14 = vsub.f32 %v983_v1, %v4178_v3  ;;  %v4181_v15 = vand.u32 4294901760, %v977_v9  ;;  %3462 = vmatprep.subr.mxu0 %v4178_v3  ;;  %v874_v19 = vadd.f32 %v873_v11, %v745_v13  ;;  %v995_v27 = vadd.f32 %v3455_v12, %v880_v4 }
 0x145   : > { %3463 = vmatpush3.msra.mxu0 %v4178_v3  ;;  %v988_v28 = vpop.f32.mrf.mxu1  ;;  %v3442_v18 = vpop.f32.mrf.mxu0  ;;  %v654_v1 = vadd.f32 %v4163_v45, %v529_v63  ;;  %v647_v45 = vadd.f32 %v4167_v49, %v523_v22 }
 0x146   : > { %v1152_v17 = vsub.f32 %v977_v9, %v4181_v15  ;;  %3464 = vmatprep.subr.mxu0 %v4181_v15  ;;  %v1146_v29 = vand.u32 4294901760, %v1145_v14  ;;  %v4192_v32 = vand.u32 4294901760, %v995_v27  ;;  %v989_v33 = vadd.f32 %v988_v28, %v874_v19 }
 0x147   : > { %3465 = vmatpush3.msra.mxu0 %v4181_v15  ;;  %v892_v20 = vadd.f32 %v3442_v18, %v769_v37  ;;  %v885_v23 = vpop.f32.mrf.mxu0  ;;  %v3458_v40 = vpop.f32.mrf.mxu1 }
 0x148   : > { %3476 = vmatprep.subr.mxu0 %v1145_v14  ;;  %3467 = vmatmul.mubr.f32.vlgmr.msra.gmra.mxu0 %v4184_v16  ;;  %v1147_v30 = vsub.f32 %v1145_v14, %v1146_v29  ;;  %v1153_v31 = vand.u32 4294901760, %v1152_v17  ;;  %v1660_v44 = vsub.f32 %v995_v27, %v4192_v32  ;;  %v4199_v47 = vand.u32 4294901760, %v989_v33 }
 0x149   : > { %3477 = vmatpush3.msra.mxu0 %v1145_v14  ;;  %3480 = vmatprep.mubr.f32.mxu0 %v4124_v7  ;;  %v886_v57 = vadd.f32 %v885_v23, %v761_v41  ;;  %v1007_v58 = vadd.f32 %v3458_v40, %v892_v20  ;;  %v1000_v59 = vpop.f32.mrf.mxu1  ;;  %v3445_v25 = vpop.f32.mrf.mxu0 }
 0x14a   : > { %3478 = vmatprep.subr.mxu0 %v1152_v17  ;;  %v1148_v34 = vand.u32 4294901760, %v1147_v30  ;;  %v1154_v35 = vsub.f32 %v1152_v17, %v1153_v31  ;;  %v1667_v52 = vsub.f32 %v989_v33, %v4199_v47  ;;  %v1661_v53 = vand.u32 4294901760, %v1660_v44 }
 0x14b   : > { %3479 = vmatpush3.msra.mxu0 %v1152_v17  ;;  %v4226_v61 = vand.u32 4294901760, %v1007_v58  ;;  %v1001_v62 = vadd.f32 %v1000_v59, %v886_v57  ;;  %v897_v9 = vpop.f32.mrf.mxu0  ;;  %v3461_v49 = vpop.f32.mrf.mxu1 }
 0x14c   : > { %3490 = vmatprep.subr.mxu0 %v1146_v29  ;;  %3481 = vmatmul.mubr.f32.vlgmr.msra.gmra.mxu0 %v4161_v42  ;;  %v1155_v39 = vand.u32 4294901760, %v1154_v35  ;;  %v1662_v55 = vsub.f32 %v1660_v44, %v1661_v53  ;;  %v1668_v56 = vand.u32 4294901760, %v1667_v52 }
 0x14d   : > { %3469 = vmatprep.subr.mxu1 %v1148_v34  ;;  %3491 = vmatpush3.msra.mxu0 %v1146_v29  ;;  %v2175_v2 = vsub.f32 %v1007_v58, %v4226_v61  ;;  %v4236_v5 = vand.u32 4294901760, %v1001_v62 }
 0x14e   : > { %3470 = vmatpush3.msra.mxu1 %v1148_v34  ;;  %3492 = vmatprep.subr.mxu0 %v1153_v31  ;;  %v1663_v46 = vand.u32 4294901760, %v1662_v55  ;;  %v1669_v60 = vsub.f32 %v1667_v52, %v1668_v56 }
 0x14f   : > { %3471 = vmatprep.subr.mxu1 %v1155_v39  ;;  %3493 = vmatpush3.msra.mxu0 %v1153_v31  ;;  %v2182_v4 = vsub.f32 %v1001_v62, %v4236_v5  ;;  %v2176_v24 = vand.u32 4294901760, %v2175_v2 }
 0x150   : > { %3472 = vmatpush3.msra.mxu1 %v1155_v39  ;;  %3494 = vmatprep.mubr.f32.mxu0 %v4121_v6  ;;  %v1670_v0 = vand.u32 4294901760, %v1669_v60 }
 0x151   : > { %3483 = vmatprep.subr.mxu1 %v4178_v3  ;;  %3504 = vmatprep.subr.mxu0 %v4192_v32  ;;  %v2177_v11 = vsub.f32 %v2175_v2, %v2176_v24  ;;  %v2183_v12 = vand.u32 4294901760, %v2182_v4 }
 0x152   : > { %3474 = vmatmul.mubr.f32.vlgmr.msra.gmra.mxu1 %v4152_v36  ;;  %3495 = vmatmul.mubr.f32.vlgmr.msra.gmra.mxu0 %v4152_v36 }
 0x153   : > { %3484 = vmatpush3.msra.mxu1 %v4178_v3  ;;  %3505 = vmatpush3.msra.mxu0 %v4192_v32  ;;  %v2184_v17 = vsub.f32 %v2182_v4, %v2183_v12 }
 0x154   : > { %3485 = vmatprep.subr.mxu1 %v4181_v15  ;;  %3506 = vmatprep.subr.mxu0 %v4199_v47 }
 0x155   : > { %3486 = vmatpush3.msra.mxu1 %v4181_v15  ;;  %3507 = vmatpush3.msra.mxu0 %v4199_v47  ;;  %v2185_v28 = vand.u32 4294901760, %v2184_v17 }
 0x156   : > { %3487 = vmatprep.mubr.f32.mxu1 %v4128_v8  ;;  %3497 = vmatprep.subr.mxu1 %v4178_v3 }
 0x157   : > { %3508 = vmatprep.mubr.f32.mxu0 %v4132_v10  ;;  %3518 = vmatprep.subr.mxu0 %v1660_v44 }
 0x158   : > { %3488 = vmatmul.mubr.f32.vlgmr.msra.gmra.mxu1 %v4172_v51  ;;  %3509 = vmatmul.mubr.f32.vlgmr.msra.gmra.mxu0 %v4184_v16 }
 0x159   : > { %3498 = vmatpush3.msra.mxu1 %v4178_v3  ;;  %3519 = vmatpush3.msra.mxu0 %v1660_v44  ;;  %v785_v3 = vadd.f32 %v4169_v50, %v654_v1  ;;  %v777_v50 = vadd.f32 %v4174_v54, %v647_v45  ;;  %v2178_v54 = vand.u32 4294901760, %v2177_v11 }
 0x15a   : > { %3499 = vmatprep.subr.mxu1 %v4181_v15  ;;  %3520 = vmatprep.subr.mxu0 %v1667_v52 }
 0x15b   : > { %3500 = vmatpush3.msra.mxu1 %v4181_v15  ;;  %3521 = vmatpush3.msra.mxu0 %v1667_v52  ;;  %v904_v26 = vadd.f32 %v3445_v25, %v785_v3  ;;  %v898_v13 = vadd.f32 %v897_v9, %v777_v50  ;;  %v1012_v15 = vpop.f32.mrf.mxu1 }
 0x15c   : > { %3501 = vmatprep.mubr.f32.mxu1 %v4121_v6  ;;  %3511 = vmatprep.subr.mxu1 %v1663_v46 }
 0x15d   : > { %3522 = vmatprep.mubr.f32.mxu0 %v4124_v7  ;;  %3532 = vmatprep.subr.mxu0 %v1661_v53  ;;  %v1019_v14 = vadd.f32 %v3461_v49, %v904_v26  ;;  %v1013_v27 = vadd.f32 %v1012_v15, %v898_v13 }
 0x15e   : > { %3502 = vmatmul.mubr.f32.vlgmr.msra.gmra.mxu1 %v4152_v36  ;;  %3523 = vmatmul.mubr.f32.vlgmr.msra.gmra.mxu0 %v4161_v42 }
 0x15f   : > { %3512 = vmatpush3.msra.mxu1 %v1663_v46  ;;  %3533 = vmatpush3.msra.mxu0 %v1661_v53  ;;  %v4264_v19 = vand.u32 4294901760, %v1019_v14  ;;  %v2605_v30 = vand.u32 4294901760, %v1013_v27 }
 0x160   : > { %3513 = vmatprep.subr.mxu1 %v1670_v0  ;;  %3534 = vmatprep.subr.mxu0 %v1668_v56 }
 0x161   : > { %3514 = vmatpush3.msra.mxu1 %v1670_v0  ;;  %3535 = vmatpush3.msra.mxu0 %v1668_v56  ;;  %v2690_v29 = vsub.f32 %v1019_v14, %v4264_v19  ;;  %v2697_v31 = vsub.f32 %v1013_v27, %v2605_v30 }
 0x162   : > { %3515 = vmatprep.mubr.f32.mxu1 %v4121_v6  ;;  %3525 = vmatprep.subr.mxu1 %v4192_v32 }
 0x163   : > { %3536 = vmatprep.mubr.f32.mxu0 %v4121_v6  ;;  %3546 = vmatprep.subr.mxu0 %v4226_v61  ;;  %v2698_v34 = vand.u32 4294901760, %v2697_v31 }
 0x164   : > { %3516 = vmatmul.mubr.f32.vlgmr.msra.gmra.mxu1 %v4152_v36  ;;  %3537 = vmatmul.mubr.f32.vlgmr.msra.gmra.mxu0 %v4152_v36 }
 0x165   : > { %3526 = vmatpush3.msra.mxu1 %v4192_v32  ;;  %3547 = vmatpush3.msra.mxu0 %v4226_v61  ;;  %v2699_v38 = vsub.f32 %v2697_v31, %v2698_v34 }
 0x166   : > { %3527 = vmatprep.subr.mxu1 %v4199_v47  ;;  %3548 = vmatprep.subr.mxu0 %v4236_v5 }
 0x167   : > { %3528 = vmatpush3.msra.mxu1 %v4199_v47  ;;  %3549 = vmatpush3.msra.mxu0 %v4236_v5 }
 0x168   : > { %3529 = vmatprep.mubr.f32.mxu1 %v4128_v8  ;;  %3539 = vmatprep.subr.mxu1 %v4192_v32 }
 0x169   : > { %3550 = vmatprep.mubr.f32.mxu0 %v4132_v10  ;;  %3560 = vmatprep.subr.mxu0 %v2175_v2 }
 0x16a   : > { %3530 = vmatmul.mubr.f32.vlgmr.msra.gmra.mxu1 %v4172_v51  ;;  %3551 = vmatmul.mubr.f32.vlgmr.msra.gmra.mxu0 %v4184_v16 }
 0x16b   : > { %3540 = vmatpush3.msra.mxu1 %v4192_v32  ;;  %3561 = vmatpush3.msra.mxu0 %v2175_v2  ;;  %v2691_v32 = vand.u32 4294901760, %v2690_v29 }
 0x16c   : > { %3541 = vmatprep.subr.mxu1 %v4199_v47  ;;  %3562 = vmatprep.subr.mxu0 %v2182_v4 }
 0x16d   : > { %3542 = vmatpush3.msra.mxu1 %v4199_v47  ;;  %3563 = vmatpush3.msra.mxu0 %v2182_v4  ;;  %v2692_v33 = vsub.f32 %v2690_v29, %v2691_v32 }
 0x16e   : > { %3543 = vmatprep.mubr.f32.mxu1 %v4121_v6  ;;  %3553 = vmatprep.subr.mxu1 %v2178_v54 }
 0x16f   : > { %3564 = vmatprep.mubr.f32.mxu0 %v4124_v7  ;;  %3574 = vmatprep.subr.mxu0 %v2176_v24  ;;  %v2693_v35 = vand.u32 4294901760, %v2692_v33 }
 0x170   : > { %3544 = vmatmul.mubr.f32.vlgmr.msra.gmra.mxu1 %v4152_v36  ;;  %3565 = vmatmul.mubr.f32.vlgmr.msra.gmra.mxu0 %v4161_v42 }
 0x171   : > { %3554 = vmatpush3.msra.mxu1 %v2178_v54  ;;  %3575 = vmatpush3.msra.mxu0 %v2176_v24 }
 0x172   : > { %3555 = vmatprep.subr.mxu1 %v2185_v28  ;;  %3576 = vmatprep.subr.mxu0 %v2183_v12 }
 0x173   : > { %3556 = vmatpush3.msra.mxu1 %v2185_v28  ;;  %3577 = vmatpush3.msra.mxu0 %v2183_v12 }
 0x174   : > { %3557 = vmatprep.mubr.f32.mxu1 %v4121_v6  ;;  %3567 = vmatprep.subr.mxu1 %v4226_v61 }
 0x175   : > { %3578 = vmatprep.mubr.f32.mxu0 %v4121_v6  ;;  %3588 = vmatprep.subr.mxu0 %v4264_v19 }
 0x176   : > { %3558 = vmatmul.mubr.f32.vlgmr.msra.gmra.mxu1 %v4152_v36  ;;  %3579 = vmatmul.mubr.f32.vlgmr.msra.gmra.mxu0 %v4152_v36 }
 0x177   : > { %3568 = vmatpush3.msra.mxu1 %v4226_v61  ;;  %3589 = vmatpush3.msra.mxu0 %v4264_v19 }
 0x178   : > { %3569 = vmatprep.subr.mxu1 %v4236_v5  ;;  %3590 = vmatprep.subr.mxu0 %v2605_v30 }
 0x179   : > { %3570 = vmatpush3.msra.mxu1 %v4236_v5  ;;  %3591 = vmatpush3.msra.mxu0 %v2605_v30 }
 0x17a   : > { %3571 = vmatprep.mubr.f32.mxu1 %v4128_v8  ;;  %3581 = vmatprep.subr.mxu1 %v4226_v61 }
 0x17b   : > { %3592 = vmatprep.mubr.f32.mxu0 %v4132_v10  ;;  %3602 = vmatprep.subr.mxu0 %v2690_v29  ;;  %v2700_v10 = vand.u32 4294901760, %v2699_v38 }
 0x17c   : > { %3572 = vmatmul.mubr.f32.vlgmr.msra.gmra.mxu1 %v4172_v51  ;;  %3593 = vmatmul.mubr.f32.vlgmr.msra.gmra.mxu0 %v4184_v16 }
 0x17d   : > { %3582 = vmatpush3.msra.mxu1 %v4226_v61  ;;  %3603 = vmatpush3.msra.mxu0 %v2690_v29 }
 0x17e   : > { %3583 = vmatprep.subr.mxu1 %v4236_v5  ;;  %3604 = vmatprep.subr.mxu0 %v2697_v31 }
 0x17f   : > { %3584 = vmatpush3.msra.mxu1 %v4236_v5  ;;  %3605 = vmatpush3.msra.mxu0 %v2697_v31 }
 0x180   : > { %3585 = vmatprep.mubr.f32.mxu1 %v4121_v6  ;;  %3595 = vmatprep.subr.mxu1 %v2693_v35 }
 0x181   : > { %3606 = vmatprep.mubr.f32.mxu0 %v4124_v7  ;;  %3616 = vmatprep.subr.mxu0 %v2691_v32 }
 0x182   : > { %3586 = vmatmul.mubr.f32.vlgmr.msra.gmra.mxu1 %v4152_v36  ;;  %3607 = vmatmul.mubr.f32.vlgmr.msra.gmra.mxu0 %v4161_v42 }
 0x183   : > { %3596 = vmatpush3.msra.mxu1 %v2693_v35  ;;  %3617 = vmatpush3.msra.mxu0 %v2691_v32 }
 0x184   : > { %3597 = vmatprep.subr.mxu1 %v2700_v10  ;;  %3618 = vmatprep.subr.mxu0 %v2698_v34 }
 0x185   : > { %3598 = vmatpush3.msra.mxu1 %v2700_v10  ;;  %3619 = vmatpush3.msra.mxu0 %v2698_v34 }
 0x186   : > { %3599 = vmatprep.mubr.f32.mxu1 %v4121_v6  ;;  %3609 = vmatprep.subr.mxu1 %v4264_v19 }
 0x187   : > { %3600 = vmatmul.mubr.f32.vlgmr.msra.gmra.mxu1 %v4152_v36  ;;  %3620 = vmatprep.mubr.f32.mxu0 %v4121_v6 }
 0x188   : > { %3610 = vmatpush3.msra.mxu1 %v4264_v19  ;;  %3613 = vmatprep.mubr.f32.mxu1 %v4128_v8 }
 0x189   : > { %3611 = vmatprep.subr.mxu1 %v2605_v30  ;;  %3621 = vmatmul.mubr.f32.vlgmr.msra.gmra.mxu0 %v4152_v36 }
 0x18a   : > { %3612 = vmatpush3.msra.mxu1 %v2605_v30 }
 0x18b   : > { %3623 = vmatprep.subr.mxu1 %v4264_v19  ;;  %3614 = vmatmul.mubr.f32.vlgmr.msra.gmra.mxu1 %v4172_v51 }
 0x18c   : > { %3624 = vmatpush3.msra.mxu1 %v4264_v19  ;;  %3627 = vmatprep.mubr.f32.mxu1 %v4121_v6 }
 0x18d   : > { %3625 = vmatprep.subr.mxu1 %v2605_v30 }
 0x18e   : > { %3626 = vmatpush3.msra.mxu1 %v2605_v30 }
 0x18f   : > { %3628 = vmatmul.mubr.f32.vlgmr.msra.gmra.mxu1 %v4152_v36 }
 0x208   : > { %v3468_v7 = vpop.f32.mrf.mxu0 }
 0x20a   : > { %v1101_v42 = vpop.f32.mrf.mxu0 }
 0x20c   : > { %v3482_v16 = vpop.f32.mrf.mxu0 }
 0x20e   : > { %v1274_v8 = vpop.f32.mrf.mxu0 }
 0x212   : > { %v3475_v39 = vpop.f32.mrf.mxu1  ;;  %v3496_v43 = vpop.f32.mrf.mxu0 }
 0x213   : > { %v1199_v44 = vadd.f32 %v3475_v39, %v3468_v7 }
 0x214   : > { %v1192_v47 = vpop.f32.mrf.mxu1  ;;  %v1441_v51 = vpop.f32.mrf.mxu0 }
 0x215   : > { %v1193_v48 = vadd.f32 %v1192_v47, %v1101_v42  ;;  %v1282_v18 = vadd.f32 %v3482_v16, %v1199_v44 }
 0x217   : > { %v1275_v21 = vadd.f32 %v1274_v8, %v1193_v48 }
 0x218   : > { %v3489_v6 = vpop.f32.mrf.mxu1  ;;  %v3510_v37 = vpop.f32.mrf.mxu0 }
 0x219   : > { %v1365_v52 = vadd.f32 %v3489_v6, %v1282_v18 }
 0x21a   : > { %v1356_v36 = vpop.f32.mrf.mxu1  ;;  %v1616_v53 = vpop.f32.mrf.mxu0 }
 0x21b   : > { %v1357_v20 = vadd.f32 %v1356_v36, %v1275_v21  ;;  %v1448_v23 = vadd.f32 %v3496_v43, %v1365_v52 }
 0x21d   : > { %v1442_v40 = vadd.f32 %v1441_v51, %v1357_v20 }
 0x21e   : > { %v3503_v41 = vpop.f32.mrf.mxu1  ;;  %v3524_v55 = vpop.f32.mrf.mxu0 }
 0x21f   : > { %v1527_v56 = vadd.f32 %v3503_v41, %v1448_v23 }
 0x220   : > { %v1520_v57 = vpop.f32.mrf.mxu1  ;;  %v1789_v58 = vpop.f32.mrf.mxu0 }
 0x221   : > { %1532 = vst.msk [vmem:[%s4310_s19 + $0x8] sm:$0xff] %vm1530_vm1, %v1527_v56  ;;  %v1521_v59 = vadd.f32 %v1520_v57, %v1442_v40  ;;  %1537 = vrot.lane.b32.xlu0 %v1527_v56, %s3818_s26 }
 0x223   : > { %1531 = vst.msk [vmem:[%s4310_s19] sm:$0xff] %vm1530_vm1, %v1521_v59 }
 0x224   : > { %v3517_v46 = vpop.f32.mrf.mxu1  ;;  %v3538_v60 = vpop.f32.mrf.mxu0 }
 0x225   : > { %v1714_v61 = vadd.f32 %v3517_v46, %v3510_v37  ;;  %1535 = vrot.lane.b32.xlu0 %v1521_v59, %s3818_s26 }
 0x226   : > { %v1707_v62 = vpop.f32.mrf.mxu1  ;;  %v1956_v63 = vpop.f32.mrf.mxu0 }
 0x227   : > { %v1708_v0 = vadd.f32 %v1707_v62, %v1616_v53  ;;  %v1797_v1 = vadd.f32 %v3524_v55, %v1714_v61 }
 0x229   : > { %v1790_v2 = vadd.f32 %v1789_v58, %v1708_v0 }
 0x22a   : > { %v3531_v5 = vpop.f32.mrf.mxu1  ;;  %v3552_v22 = vpop.f32.mrf.mxu0 }
 0x22b   : > { %v1880_v25 = vadd.f32 %v3531_v5, %v1797_v1 }
 0x22c   : > { %v1871_v45 = vpop.f32.mrf.mxu1  ;;  %v2131_v3 = vpop.f32.mrf.mxu0 }
 0x22d   : > { %v1872_v4 = vadd.f32 %v1871_v45, %v1790_v2  ;;  %v1963_v24 = vadd.f32 %v3538_v60, %v1880_v25 }
 0x22f   : > { %v1957_v26 = vadd.f32 %v1956_v63, %v1872_v4 }
 0x230   : > { %v3545_v9 = vpop.f32.mrf.mxu1  ;;  %v3566_v49 = vpop.f32.mrf.mxu0 }
 0x231   : > { %v2042_v50 = vadd.f32 %v3545_v9, %v1963_v24 }
 0x232   : > { %v2035_v11 = vpop.f32.mrf.mxu1  ;;  %v2304_v12 = vpop.f32.mrf.mxu0 }
 0x233   : > { %3194 = vst.msk [vmem:[%s4310_s19 + $0x28] sm:$0xff] %vm1530_vm1, %v2042_v50  ;;  %2052 = vrot.lane.b32.xlu1 %v2042_v50, %s3818_s26  ;;  %v2036_v13 = vadd.f32 %v2035_v11, %v1957_v26 }
 0x235   : > { %3193 = vst.msk [vmem:[%s4310_s19 + $0x20] sm:$0xff] %vm1530_vm1, %v2036_v13 }
 0x236   : > { %v3559_v14 = vpop.f32.mrf.mxu1  ;;  %v3580_v15 = vpop.f32.mrf.mxu0 }
 0x237   : > { %v2229_v54 = vadd.f32 %v3559_v14, %v3552_v22  ;;  %2050 = vrot.lane.b32.xlu1 %v2036_v13, %s3818_s26 }
 0x238   : > { %v2222_v17 = vpop.f32.mrf.mxu1  ;;  %v2471_v19 = vpop.f32.mrf.mxu0 }
 0x239   : > { %v2223_v27 = vadd.f32 %v2222_v17, %v2131_v3  ;;  %v2312_v28 = vadd.f32 %v3566_v49, %v2229_v54 }
 0x23b   : > { %v2305_v29 = vadd.f32 %v2304_v12, %v2223_v27 }
 0x23c   : > { %v3573_v30 = vpop.f32.mrf.mxu1  ;;  %v3594_v31 = vpop.f32.mrf.mxu0 }
 0x23d   : > { %v2395_v32 = vadd.f32 %v3573_v30, %v2312_v28 }
 0x23e   : > { %v2386_v33 = vpop.f32.mrf.mxu1  ;;  %v2646_v38 = vpop.f32.mrf.mxu0 }
 0x23f   : > { %v2387_v34 = vadd.f32 %v2386_v33, %v2305_v29  ;;  %v2478_v35 = vadd.f32 %v3580_v15, %v2395_v32 }
 0x241   : > { %v2472_v10 = vadd.f32 %v2471_v19, %v2387_v34 }
 0x242   : > { %v3587_v7 = vpop.f32.mrf.mxu1  ;;  %v3608_v16 = vpop.f32.mrf.mxu0 }
 0x243   : > { %v2557_v42 = vadd.f32 %v3587_v7, %v2478_v35 }
 0x244   : > { %v2550_v8 = vpop.f32.mrf.mxu1  ;;  %v2819_v44 = vpop.f32.mrf.mxu0 }
 0x245   : > { %3198 = vst.msk [vmem:[%s4310_s19 + $0x48] sm:$0xff] %vm1530_vm1, %v2557_v42  ;;  %v2551_v39 = vadd.f32 %v2550_v8, %v2472_v10  ;;  %2567 = vrot.lane.b32.xlu1 %v2557_v42, %s3818_s26 }
 0x247   : > { %3197 = vst.msk [vmem:[%s4310_s19 + $0x40] sm:$0xff] %vm1530_vm1, %v2551_v39  ;;  %v3601_v43 = vpop.f32.mrf.mxu1  ;;  %2565 = vrot.lane.b32.xlu0 %v2551_v39, %s3818_s26 }
 0x248   : > { %v2744_v47 = vadd.f32 %v3601_v43, %v3594_v31 }
 0x249   : > { %v2737_v51 = vpop.f32.mrf.mxu1  ;;  %v3622_v6 = vpop.f32.mrf.mxu0 }
 0x24a   : > { %v2738_v48 = vadd.f32 %v2737_v51, %v2646_v38  ;;  %v2827_v18 = vadd.f32 %v3608_v16, %v2744_v47 }
 0x24b   : > { %v3615_v21 = vpop.f32.mrf.mxu1  ;;  %v2986_v23 = vpop.f32.mrf.mxu0 }
 0x24c   : > { %v2820_v37 = vadd.f32 %v2819_v44, %v2738_v48  ;;  %v2910_v52 = vadd.f32 %v3615_v21, %v2827_v18 }
 0x24d   : > { %v2901_v36 = vpop.f32.mrf.mxu1 }
 0x24e   : > { %v2902_v53 = vadd.f32 %v2901_v36, %v2820_v37  ;;  %v2993_v20 = vadd.f32 %v3622_v6, %v2910_v52 }
 0x24f   : > { %v3629_v40 = vpop.f32.mrf.mxu1 }
 0x250   : > { %v2987_v41 = vadd.f32 %v2986_v23, %v2902_v53  ;;  %v3072_v55 = vadd.f32 %v3629_v40, %v2993_v20 }
 0x251   : > { %v3065_v56 = vpop.f32.mrf.mxu1 }
 0x252   : > { %3202 = vst.msk [vmem:[%s4310_s19 + $0x68] sm:$0xff] %vm1530_vm1, %v3072_v55  ;;  %v3066_v57 = vadd.f32 %v3065_v56, %v2987_v41  ;;  %3082 = vrot.lane.b32.xlu1 %v3072_v55, %s3818_s26 }
 0x254   : > { %3201 = vst.msk [vmem:[%s4310_s19 + $0x60] sm:$0xff] %vm1530_vm1, %v3066_v57  ;;  %3080 = vrot.lane.b32.xlu0 %v3066_v57, %s3818_s26 }
 0x293   : > { %v1538_v58 = vpop.permute.xlu0 %1537 }
 0x294   : > { %1542 = vst.msk [vmem:[%s4310_s19 + $0x18] sm:$0xff] %vm1530_vm1, %v1538_v58 }
 0x297   : > { %v1536_v59 = vpop.permute.xlu0 %1535 }
 0x298   : > { %1541 = vst.msk [vmem:[%s4310_s19 + $0x10] sm:$0xff] %vm1530_vm1, %v1536_v59 }
 0x2a5   : > { %v2053_v46 = vpop.permute.xlu1 %2052 }
 0x2a6   : > { %3196 = vst.msk [vmem:[%s4310_s19 + $0x38] sm:$0xff] %vm1530_vm1, %v2053_v46 }
 0x2a9   : > { %v2051_v60 = vpop.permute.xlu1 %2050 }
 0x2aa   : > { %3195 = vst.msk [vmem:[%s4310_s19 + $0x30] sm:$0xff] %vm1530_vm1, %v2051_v60 }
 0x2b7   : > { %v2568_v61 = vpop.permute.xlu1 %2567 }
 0x2b8   : > { %3200 = vst.msk [vmem:[%s4310_s19 + $0x58] sm:$0xff] %vm1530_vm1, %v2568_v61 }
 0x2b9   : > { %v2566_v62 = vpop.permute.xlu0 %2565 }
 0x2ba   : > { %3199 = vst.msk [vmem:[%s4310_s19 + $0x50] sm:$0xff] %vm1530_vm1, %v2566_v62 }
 0x2c4   : > { %v3083_v63 = vpop.permute.xlu1 %3082 }
 0x2c5   : > { %3204 = vst.msk [vmem:[%s4310_s19 + $0x78] sm:$0xff] %vm1530_vm1, %v3083_v63 }
 0x2c6   : > { %v3081_v0 = vpop.permute.xlu0 %3080 }
 0x2c7   : > { %3203 = vst.msk [vmem:[%s4310_s19 + $0x70] sm:$0xff] %vm1530_vm1, %v3081_v0 }
 0x2c8 PF: > { %p14_p7 = scmp.ge.s32.totalorder %s3910_s6, 4   ;;  %s4381_s12 = smov %s3803_s13 }
 0x2c9   : > { %s4382_s13 = smov %s3807_s14  ;;  %s4383_s14 = smov %s3921_s10 }
 0x2ca   : > { %s4384_s15 = smov %s3910_s6  ;;  %16 = sbr.rel (!%p14_p7) target bundleno = 4 (0x4), region = 83 }
 0x2cf   :  { %3112 = vsyncpa [#allocation3], 1 }
 0x2d0   :  { %3114 = vsyncpa [#allocation3 + $0x1], 1 }
 0x2d1   :  { %3115 = vsyncpa [#allocation5], 1 }

</bundles_post_ra>
